<compile_context>
chip_gen: v6e
topology: v6e:2x2x1
jax: 0.10.0
libtpu: 0.0.40
codegen_flags: <defaults>
</compile_context>

<pallas_src>
import functools

import jax
import jax.numpy as jnp
from jax.experimental import pallas as pl
from jax.experimental.pallas import tpu as pltpu


def _round_up(x: int, m: int) -> int:
    return (x + m - 1) // m * m


def _cdiv(a: int, b: int) -> int:
    return -(-a // b)


# --------------------------------------------------------------------------
# Kernel
# --------------------------------------------------------------------------
def policy_net_kernel(x_ref, w1_ref, b1_ref, w2_ref, b2_ref, out_ref):
    # x: (TB, S), w1: (S, HP), b1: (1, HP), w2: (HP, AP), b2: (1, AP), out: (TB, AP)
    x = x_ref[...]

    # fc1 + ReLU : MXU matmul with f32 accumulation, bias + ReLU in f32.
    h = jnp.dot(x, w1_ref[...], preferred_element_type=jnp.float32) + b1_ref[...]
    h = jnp.maximum(h, 0.0)

    # fc2 : cast back to the weight dtype only for the matmul (bf16 path).
    logits = (
        jnp.dot(h.astype(w2_ref.dtype), w2_ref[...], preferred_element_type=jnp.float32)
        + b2_ref[...]
    )
    # Padded action lanes already carry -1e30 via b2 (mask folded on the host),
    # so no iota / where is needed here.

    # Numerically stable softmax along the last (lane) axis.
    m = jnp.max(logits, axis=-1, keepdims=True)
    e = jnp.exp(logits - m)
    denom = jnp.sum(e, axis=-1, keepdims=True)
    # approx=False: rows sum to 1 exactly (policy probabilities feed sampling).
    out_ref[...] = (e * pl.reciprocal(denom, approx=False)).astype(out_ref.dtype)


# --------------------------------------------------------------------------
# Parameter preparation (done ONCE, outside the forward path)
# --------------------------------------------------------------------------
def prepare_params(w1, b1, w2, b2, *, compute_dtype=jnp.bfloat16):
    """Pad / cast PolicyNet params. w1:(S,H), w2:(H,A) stored as (in, out)."""
    state_dim, hidden_dim = w1.shape
    _, action_dim = w2.shape
    HP = _round_up(hidden_dim, 128)   # lane padding for weights only
    AP = _round_up(action_dim, 128)

    w1_p = jnp.pad(w1, ((0, 0), (0, HP - hidden_dim))).astype(compute_dtype)
    b1_p = jnp.pad(b1.reshape(1, -1), ((0, 0), (0, HP - hidden_dim))).astype(jnp.float32)
    w2_p = jnp.pad(w2, ((0, HP - hidden_dim), (0, AP - action_dim))).astype(compute_dtype)
    # Fold the padded-action mask into b2: padded w2 columns are zero, so the
    # padded logits equal b2 exactly; -1e30 there kills them in the softmax.
    b2_p = (
        jnp.full((1, AP), -1e30, jnp.float32)
        .at[0, :action_dim]
        .set(b2.reshape(-1).astype(jnp.float32))
    )
    return {"w1": w1_p, "b1": b1_p, "w2": w2_p, "b2": b2_p, "action_dim": action_dim}


# --------------------------------------------------------------------------
# Forward (jitted: batch pad + pallas_call + slice in one dispatch)
# --------------------------------------------------------------------------
@functools.partial(jax.jit, static_argnames=("action_dim", "batch_tile", "core_parallel"))
def _policy_net_forward(state, w1_p, b1_p, w2_p, b2_p, *,
                        action_dim, batch_tile=1024, core_parallel=False):
    batch, state_dim = state.shape
    HP = w1_p.shape[1]
    AP = w2_p.shape[1]
    compute_dtype = w1_p.dtype

    # bf16 packs 2 rows / sublane -> align batch tiles to 16 rows for bf16.
    row_align = 16 if compute_dtype == jnp.bfloat16 else 8
    if batch <= batch_tile:
        num_tiles = 1
        TB = _round_up(batch, row_align)
    else:
        # Ragged batches: spread rows over ceil(batch / batch_tile) tiles so we
        # never pad by (almost) a whole tile.
        num_tiles = _cdiv(batch, batch_tile)
        TB = _round_up(_cdiv(batch, num_tiles), row_align)
    B_pad = num_tiles * TB

    # Pad batch rows only; x keeps its natural feature width (no lane padding
    # of the activation in HBM). Padded rows yield softmax(b2) garbage that is
    # sliced off below.
    x_p = jnp.pad(state.astype(compute_dtype), ((0, B_pad - batch), (0, 0)))

    def _resident(shape):
        # Constant index_map -> same block every grid step; single-buffer it.
        return pl.BlockSpec(shape, lambda i: (0, 0), pipeline_mode=pl.Buffered(1))

    # CORE_PARALLEL shards batch tiles across the 2 TensorCores on v7x;
    # default is a plain sequential loop (portable to 1-TC v5e/v6e).
    sem = pltpu.CORE_PARALLEL if core_parallel else pltpu.ARBITRARY

    out_p = pl.pallas_call(
        policy_net_kernel,
        out_shape=jax.ShapeDtypeStruct((B_pad, AP), jnp.float32),
        grid_spec=pltpu.PrefetchScalarGridSpec(
            num_scalar_prefetch=0,
            grid=(num_tiles,),
            in_specs=[
                pl.BlockSpec((TB, state_dim), lambda i: (i, 0)),  # x: batch-tiled
                _resident((state_dim, HP)),                       # w1
                _resident((1, HP)),                               # b1
                _resident((HP, AP)),                              # w2
                _resident((1, AP)),                               # b2 (mask folded in)
            ],
            out_specs=pl.BlockSpec((TB, AP), lambda i: (i, 0)),
        ),
        compiler_params=pltpu.CompilerParams(
            dimension_semantics=(sem,),
            vmem_limit_bytes=48 * 1024 * 1024,  # fits TB=1024 tiles; < v7x 64 MiB physical
        ),
    )(x_p, w1_p, b1_p, w2_p, b2_p)

    # Strip batch / action padding (fused into the jitted program).
    return out_p[:batch, :action_dim]


def policy_net_forward(state, params, *, batch_tile=1024, core_parallel=False):
    """state: (B, state_dim) -> (B, action_dim) softmax probabilities (f32)."""
    return _policy_net_forward(
        state, params["w1"], params["b1"], params["w2"], params["b2"],
        action_dim=params["action_dim"], batch_tile=batch_tile,
        core_parallel=core_parallel)


# --------------------------------------------------------------------------
# Init mimicking nn.Linear's uniform(-1/sqrt(fan_in), 1/sqrt(fan_in))
# --------------------------------------------------------------------------
def init_params(key, state_dim, hidden_dim, action_dim):
    k1, k2, k3, k4 = jax.random.split(key, 4)
    bound1 = 1.0 / jnp.sqrt(state_dim)
    bound2 = 1.0 / jnp.sqrt(hidden_dim)
    # Stored as (in_features, out_features) = transpose of PyTorch's (out, in).
    w1 = jax.random.uniform(k1, (state_dim, hidden_dim), jnp.float32, -bound1, bound1)
    b1 = jax.random.uniform(k2, (1, hidden_dim), jnp.float32, -bound1, bound1)
    w2 = jax.random.uniform(k3, (hidden_dim, action_dim), jnp.float32, -bound2, bound2)
    b2 = jax.random.uniform(k4, (1, action_dim), jnp.float32, -bound2, bound2)
    return w1, b1, w2, b2


if __name__ == "__main__":
    state_dim, hidden_dim, action_dim = 16, 32, 4
    batch = 8

    key = jax.random.PRNGKey(0)
    k_params, k_state = jax.random.split(key)
    w1, b1, w2, b2 = init_params(k_params, state_dim, hidden_dim, action_dim)
    state = jax.random.normal(k_state, (batch, state_dim), jnp.float32)

    # Parameter prep happens once, outside the (jitted) forward path.
    params = prepare_params(w1, b1, w2, b2, compute_dtype=jnp.bfloat16)

    probs = policy_net_forward(state, params)
    probs = jax.block_until_ready(probs)

    # Reference check in plain JAX (same math as the PyTorch forward, f32).
    h_ref = jnp.maximum(state @ w1 + b1, 0.0)
    ref = jax.nn.softmax(h_ref @ w2 + b2, axis=1)
    assert probs.shape == (batch, action_dim)
    # Tolerance accounts for bf16-quantized inputs/weights vs the f32 reference.
    assert jnp.allclose(probs, ref, atol=2e-2), "mismatch vs reference"
    # Exact reciprocal in-kernel -> rows normalize to 1 (tight tolerance).
    assert jnp.allclose(jnp.sum(probs, axis=1), 1.0, atol=1e-4)

    print("KERNEL_OK")
</pallas_src>

<mosaic_0001>
module attributes {stable_mosaic.version = 11 : i64} {
  func.func @policy_net_kernel(%arg0: i32, %arg1: memref<16x16xbf16, #tpu.memory_space<vmem>>, %arg2: memref<16x128xbf16, #tpu.memory_space<vmem>>, %arg3: memref<1x128xf32, #tpu.memory_space<vmem>>, %arg4: memref<128x128xbf16, #tpu.memory_space<vmem>>, %arg5: memref<1x128xf32, #tpu.memory_space<vmem>>, %arg6: memref<16x128xf32, #tpu.memory_space<vmem>>) attributes {dimension_semantics = [#tpu.dimension_semantics<arbitrary>], iteration_bounds = array<i64: 1>, scalar_prefetch = 0 : i64, scratch_operands = 0 : i64, tpu.core_type = #tpu.core_type<tc>, window_params = [{transform_indices = @transform_0, window_bounds = array<i64: 16, 16>}, {pipeline_mode = #tpu.pipeline_mode<synchronous>, transform_indices = @transform_1, window_bounds = array<i64: 16, 128>}, {pipeline_mode = #tpu.pipeline_mode<synchronous>, transform_indices = @transform_2, window_bounds = array<i64: 1, 128>}, {pipeline_mode = #tpu.pipeline_mode<synchronous>, transform_indices = @transform_3, window_bounds = array<i64: 128, 128>}, {pipeline_mode = #tpu.pipeline_mode<synchronous>, transform_indices = @transform_4, window_bounds = array<i64: 1, 128>}, {transform_indices = @transform_5, window_bounds = array<i64: 16, 128>}]} {
    %c0 = arith.constant 0 : index
    %c0_0 = arith.constant 0 : index
    %0 = vector.load %arg1[%c0, %c0_0] : memref<16x16xbf16, #tpu.memory_space<vmem>>, vector<16x16xbf16>
    %c0_1 = arith.constant 0 : index
    %c0_2 = arith.constant 0 : index
    %1 = vector.load %arg2[%c0_1, %c0_2] : memref<16x128xbf16, #tpu.memory_space<vmem>>, vector<16x128xbf16>
    %cst = arith.constant dense<0.000000e+00> : vector<16x128xf32>
    %2 = tpu.matmul %0, %1, %cst {dimension_numbers = #tpu.dot_dimension_numbers<[1], [0], [0], [1], [0, 0, 1, 1], [], []>} : vector<16x16xbf16>, vector<16x128xbf16>, vector<16x128xf32> -> vector<16x128xf32>
    %c0_3 = arith.constant 0 : index
    %c0_4 = arith.constant 0 : index
    %3 = vector.load %arg3[%c0_3, %c0_4] : memref<1x128xf32, #tpu.memory_space<vmem>>, vector<1x128xf32>
    %4 = vector.broadcast %3 : vector<1x128xf32> to vector<16x128xf32>
    %5 = arith.addf %2, %4 : vector<16x128xf32>
    %cst_5 = arith.constant 0.000000e+00 : f32
    %6 = vector.broadcast %cst_5 : f32 to vector<16x128xf32>
    %7 = arith.maximumf %5, %6 : vector<16x128xf32>
    %8 = arith.truncf %7 : vector<16x128xf32> to vector<16x128xbf16>
    %c0_6 = arith.constant 0 : index
    %c0_7 = arith.constant 0 : index
    %9 = vector.load %arg4[%c0_6, %c0_7] : memref<128x128xbf16, #tpu.memory_space<vmem>>, vector<128x128xbf16>
    %cst_8 = arith.constant dense<0.000000e+00> : vector<16x128xf32>
    %10 = tpu.matmul %8, %9, %cst_8 {dimension_numbers = #tpu.dot_dimension_numbers<[1], [0], [0], [1], [0, 0, 1, 1], [], []>} : vector<16x128xbf16>, vector<128x128xbf16>, vector<16x128xf32> -> vector<16x128xf32>
    %c0_9 = arith.constant 0 : index
    %c0_10 = arith.constant 0 : index
    %11 = vector.load %arg5[%c0_9, %c0_10] : memref<1x128xf32, #tpu.memory_space<vmem>>, vector<1x128xf32>
    %12 = vector.broadcast %11 : vector<1x128xf32> to vector<16x128xf32>
    %13 = arith.addf %10, %12 : vector<16x128xf32>
    %cst_11 = arith.constant dense<0xFF800000> : vector<16xf32>
    %14 = vector.multi_reduction <maximumf>, %13, %cst_11 [1] : vector<16x128xf32> to vector<16xf32>
    %15 = vector.shape_cast %14 : vector<16xf32> to vector<16x1xf32>
    %16 = vector.broadcast %15 : vector<16x1xf32> to vector<16x128xf32>
    %17 = arith.subf %13, %16 : vector<16x128xf32>
    %18 = math.exp %17 : vector<16x128xf32>
    %cst_12 = arith.constant dense<0.000000e+00> : vector<16xf32>
    %19 = vector.multi_reduction <add>, %18, %cst_12 [1] : vector<16x128xf32> to vector<16xf32>
    %20 = vector.shape_cast %19 : vector<16xf32> to vector<16x1xf32>
    %21 = tpu.reciprocal %20 : vector<16x1xf32> -> vector<16x1xf32>
    %22 = vector.broadcast %21 : vector<16x1xf32> to vector<16x128xf32>
    %23 = arith.mulf %18, %22 : vector<16x128xf32>
    %c0_13 = arith.constant 0 : index
    %c0_14 = arith.constant 0 : index
    %24 = vector.load %arg6[%c0_13, %c0_14] : memref<16x128xf32, #tpu.memory_space<vmem>>, vector<16x128xf32>
    tpu.vector_store %arg6[%c0_13, %c0_14], %23 {strides = array<i32>} : memref<16x128xf32, #tpu.memory_space<vmem>>, vector<16x128xf32>,
    return
  }
  func.func @transform_0(%arg0: i32) -> (i32, i32) {
    %c0_i32 = arith.constant 0 : i32
    %c0_i32_0 = arith.constant 0 : i32
    return %arg0, %c0_i32 : i32, i32
  }
  func.func @transform_1(%arg0: i32) -> (i32, i32) {
    %c0_i32 = arith.constant 0 : i32
    %c0_i32_0 = arith.constant 0 : i32
    %c0_i32_1 = arith.constant 0 : i32
    return %c0_i32, %c0_i32_0 : i32, i32
  }
  func.func @transform_2(%arg0: i32) -> (i32, i32) {
    %c0_i32 = arith.constant 0 : i32
    %c0_i32_0 = arith.constant 0 : i32
    %c0_i32_1 = arith.constant 0 : i32
    return %c0_i32, %c0_i32_0 : i32, i32
  }
  func.func @transform_3(%arg0: i32) -> (i32, i32) {
    %c0_i32 = arith.constant 0 : i32
    %c0_i32_0 = arith.constant 0 : i32
    %c0_i32_1 = arith.constant 0 : i32
    return %c0_i32, %c0_i32_0 : i32, i32
  }
  func.func @transform_4(%arg0: i32) -> (i32, i32) {
    %c0_i32 = arith.constant 0 : i32
    %c0_i32_0 = arith.constant 0 : i32
    %c0_i32_1 = arith.constant 0 : i32
    return %c0_i32, %c0_i32_0 : i32, i32
  }
  func.func @transform_5(%arg0: i32) -> (i32, i32) {
    %c0_i32 = arith.constant 0 : i32
    %c0_i32_0 = arith.constant 0 : i32
    return %arg0, %c0_i32 : i32, i32
  }
}

</mosaic_0001>

<bundles_post_ra>
// kernel: _policy_net_forward.1
= control target key start
LH: loop header
LB: loop body
LE: loop exit
PB: predicated region body
PF: predicated region fallthrough
CT: control target
= control target key end

     0   :  { %10 = vsyncpa [#allocation3], 0  ;;  %s337_s18 = smov [#allocation2]   ;;  %s393_s0 = inlined_call_operand.vmem [shape: bf16[16,16], index: 0, kind: input, shape index: {}]   ;;  %s394_s1 = inlined_call_operand.vmem [shape: bf16[16,128], index: 1, kind: input, shape index: {}]   ;;  %s395_s2 = inlined_call_operand.vmem [shape: f32[1,128], index: 2, kind: input, shape index: {}]   ;;  %s396_s3 = inlined_call_operand.hbm [shape: bf16[128,128], index: 3, kind: input, shape index: {}]   ;;  %s397_s4 = inlined_call_operand.vmem [shape: f32[1,128], index: 4, kind: input, shape index: {}]   ;;  %s398_s5 = inlined_call_operand.vmem [shape: f32[16,128], index: 5, kind: output, shape index: {}]  }
   0x1   :  { %s22_s19 = sshll.u32 %s337_s18, 4  ;;  %s23_s19 = int_to_ptr.vmem [resolvable:$true] %s22_s19 }
   0x2   :  { %s323_s20 = scalar_lea.vmem %s23_s19, 1024  ;;  %p328_p1 = scmp.lt.s32.totalorder %s23_s19, %s23_s19 }
   0x3   :  { %p324_p0 = scmp.ne.s32.totalorder %s23_s19, %s323_s20  ;;  %p329_p2 = scmp.lt.s32.totalorder %s323_s20, %s323_s20 }
   0x5   :  { %p330_p3 = por %p329_p2, %p328_p1 }
   0x7   :  { %p331_p4 = pnand %p330_p3, %p324_p0 }
   0x9   :  { %334 = shalt.err (!%p331_p4)
}
   0xa   :  { %s338_s21 = smov 64   ;;  %s339_s22 = smov 4  }
   0xb   :  { %28 = dma.hbm_to_vmem [thread:$0]  %s396_s3, 1024, %s23_s19, [#allocation3], %s338_s21, %s338_s21, %s339_s22  }
   0xc   :  { %335 = dma.done.wait [#allocation3], 1024  }
   0xd   :  { %336 = vsyncadd [#allocation3], 4294966272  ;;  %v340_v0 = vmov 0.0   ;;  %vm341_vm0 = vmmov 0   ;;  %v297_v1 = vld [vmem:[%s394_s1] sm:$0xff]   ;;  %vm57_vm1 = vcmask 130048  }
   0xe   :  { %266 = vmatprep.subr.bf16.mxu0 %v340_v0  ;;  %268 = vmatprep.mubr.msk.bf16.mxu0 %vm341_vm0, %v340_v0  ;;  %v298_v2 = vld [vmem:[%s393_s0] sm:$0xff]   ;;  %v299_v3 = vld [vmem:[#allocation2 + $0x38] sm:$0xff]   ;;  %v300_v4 = vld [vmem:[#allocation2 + $0x30] sm:$0xff]  }
   0xf   :  { %272 = vmatprep.subr.bf16.mxu1 %v340_v0  ;;  %288 = vmatprep.mubr.msk.bf16.mxu1 %vm341_vm0, %v340_v0  ;;  %v301_v5 = vld [vmem:[#allocation2 + $0x28] sm:$0xff]   ;;  %v302_v6 = vld [vmem:[#allocation2 + $0x20] sm:$0xff]   ;;  %v303_v7 = vld [vmem:[#allocation2 + $0x18] sm:$0xff]  }
  0x10   :  { %267 = vmatpush3.bf16.msra.mxu0 %v297_v1  ;;  %273 = vmatpush3.bf16.msra.mxu1 %v299_v3  ;;  %v304_v8 = vld [vmem:[#allocation2 + $0x10] sm:$0xff]   ;;  %v305_v9 = vld [vmem:[#allocation2 + $0x8] sm:$0xff]   ;;  %v306_v10 = vld [vmem:[#allocation2] sm:$0xff]  }
  0x11   :  { %274 = vmatprep.subr.bf16.mxu1 %v340_v0  ;;  %v242_v11 = vld [vmem:[%s395_s2] ss:$0 sm:$0xff] }
  0x12   :  { %v246_v21 = vld [vmem:[%s397_s4] ss:$0 sm:$0xff] }
  0x13   :  { %269 = vmatmul.mubr.msk.bf16.vlgmr.msra.gmra.mxu0 %vm57_vm1, %v298_v2 }
  0x14   :  { %275 = vmatpush3.bf16.msra.mxu1 %v300_v4 }
  0x15   :  { %276 = vmatprep.subr.bf16.mxu1 %v340_v0 }
  0x18   :  { %277 = vmatpush3.bf16.msra.mxu1 %v301_v5 }
  0x19   :  { %278 = vmatprep.subr.bf16.mxu1 %v340_v0 }
  0x1c   :  { %279 = vmatpush3.bf16.msra.mxu1 %v302_v6 }
  0x1d   :  { %280 = vmatprep.subr.bf16.mxu1 %v340_v0 }
  0x20   :  { %281 = vmatpush3.bf16.msra.mxu1 %v303_v7 }
  0x21   :  { %282 = vmatprep.subr.bf16.mxu1 %v340_v0 }
  0x24   :  { %283 = vmatpush3.bf16.msra.mxu1 %v304_v8 }
  0x25   :  { %284 = vmatprep.subr.bf16.mxu1 %v340_v0 }
  0x28   :  { %285 = vmatpush3.bf16.msra.mxu1 %v305_v9 }
  0x29   :  { %286 = vmatprep.subr.bf16.mxu1 %v340_v0 }
  0x2c   :  { %287 = vmatpush3.bf16.msra.mxu1 %v306_v10 }
  0xd3   :  { %v95_v12 = vpop.f32.mrf.mxu0 }
  0xd4   :  { %v96_v14 = vadd.f32 %v242_v11, %v95_v12 }
  0xd5   :  { %v270_v13 = vpop.f32.mrf.mxu0 }
  0xd6   :  { %v102_v18 = vmax.f32 %v96_v14, 0.0 }
  0xd7   :  { %v98_v15 = vpop.f32.mrf.mxu0 }
  0xd8   :  { %v99_v16 = vadd.f32 %v242_v11, %v98_v15 }
  0xd9   :  { %v271_v17 = vpop.f32.mrf.mxu0 }
  0xda   :  { %v103_v19 = vmax.f32 %v99_v16, 0.0 }
  0xdc   :  { %v104_v20 = vpack.c.bf16 %v103_v19, %v102_v18 }
  0xde   :  { %289 = vmatmul.mubr.bf16.vlgmr.msra.gmra.mxu1 %v104_v20 }
 0x19e   :  { %v210_v22 = vpop.f32.mrf.mxu1 }
 0x19f   :  { %v211_v23 = vadd.f32 %v246_v21, %v210_v22 }
 0x1a0   :  { %v290_v24 = vpop.f32.mrf.mxu1 }
 0x1a1   :  { %217 = vmax.xlane.f32.xlu0 %v211_v23 }
 0x1a2   :  { %v213_v25 = vpop.f32.mrf.mxu1 }
 0x1a3   :  { %v214_v26 = vadd.f32 %v246_v21, %v213_v25 }
 0x1a4   :  { %v291_v27 = vpop.f32.mrf.mxu1 }
 0x1a5   :  { %219 = vmax.xlane.f32.xlu0 %v214_v26 }
 0x22a   :  { %v218_v28 = vpop.xlane.xlu0 %217 }
 0x22b   :  { %v221_v29 = vsub.f32 %v211_v23, %v218_v28 }
 0x22d   :  { %v223_v30 = vmul.f32 1.442695, %v221_v29 }
 0x22e   :  { %v220_v31 = vpop.xlane.xlu0 %219 }
 0x22f   :  { %307 = vpow2.f32 %v223_v30  ;;  %v222_v32 = vsub.f32 %v214_v26, %v220_v31 }
 0x231   :  { %v225_v33 = vmul.f32 1.442695, %v222_v32 }
 0x233   :  { %309 = vpow2.f32 %v225_v33 }
 0x23c   :  { %v308_v34 = vpop.eup %307 }
 0x23d   :  { %227 = vadd.xlane.f32.xlu1 %v308_v34 }
 0x240   :  { %v310_v35 = vpop.eup %309 }
 0x241   :  { %229 = vadd.xlane.f32.xlu1 %v310_v35 }
 0x2c6   :  { %v228_v36 = vpop.xlane.xlu1 %227 }
 0x2c7   :  { %311 = vrcp.f32 %v228_v36 }
 0x2ca   :  { %v230_v37 = vpop.xlane.xlu1 %229 }
 0x2cb   :  { %313 = vrcp.f32 %v230_v37 }
 0x2d4   :  { %v312_v38 = vpop.eup %311 }
 0x2d5   :  { %v233_v39 = vmul.f32 %v312_v38, %v308_v34 }
 0x2d7   :  { %235 = vst [vmem:[%s398_s5] sm:$0xff] %v233_v39 }
 0x2d8   :  { %v314_v40 = vpop.eup %313 }
 0x2d9   :  { %v234_v41 = vmul.f32 %v314_v40, %v310_v35 }
 0x2db   :  { %236 = vst [vmem:[%s398_s5 + $0x8] sm:$0xff] %v234_v41 }
 0x2dc   :  { %241 = vsyncpa [#allocation3], 1 }

</bundles_post_ra>
